<compile_context>
chip_gen: v7x
topology: tpu7x:2x2x1
jax: 0.10.0
libtpu: 0.0.40
codegen_flags: <defaults>
</compile_context>

<pallas_src>
import functools

import jax
import jax.numpy as jnp
from jax import lax
from jax.experimental import pallas as pl
from jax.experimental.pallas import tpu as pltpu

EPS = 1e-6


# -----------------------------------------------------------------------------
# Hardware-aware sizing helpers
# -----------------------------------------------------------------------------
def _vmem_capacity_bytes():
    """Per-core VMEM capacity (generation aware), conservative fallback = v7x."""
    try:
        info = pltpu.get_tpu_info()
        cap = getattr(info, "vmem_capacity_bytes", None)
        if cap:
            return int(cap)
    except Exception:
        pass
    return 64 * 1024 * 1024


def _pick_tile_n(H, w_budget_bytes):
    """Column tile for W (output / N axis).

    Full H if a single-buffered bf16 (H, H) block fits the budget; otherwise the
    largest 256-/128-aligned divisor of H whose double-buffered (H, tile_n) bf16
    block fits (256 = v6e/v7x MXU tile; 128 also covers v5e)."""
    if H * H * 2 <= w_budget_bytes:
        return H
    bytes_per_col = 2 * (H * 2)                       # bf16, double-buffered
    cap = int(min(max(128, w_budget_bytes // bytes_per_col), H))
    for align in (256, 128):
        for t in range(cap - cap % align, 0, -align):
            if H % t == 0:
                return t
    # TODO(synk): ragged column tiling for H not divisible by 128.
    return H


def _pick_tile_r(R, H, act_budget_bytes):
    """Row tile: largest divisor of R whose streamed activation working set
    (x f32 + out f32, double-buffered, + bf16 LN scratch) fits the budget,
    preferring 256/128-aligned sizes (MXU M dim), then multiples of 8."""
    bytes_per_row = 2 * (H * 4) * 2 + H * 2
    cap = int(min(max(8, act_budget_bytes // bytes_per_row), R))
    for align in (256, 128, 8):
        for t in range(cap - cap % align, 0, -align):
            if R % t == 0:
                return t
    return R  # R < 8: single full-extent block


# -----------------------------------------------------------------------------
# Kernel
# -----------------------------------------------------------------------------
def residual_kernel(seed_ref, alpha_ref, lnbias_ref, x_ref, w_ref, b_ref, o_ref,
                    normed_ref, *, p, hidden, tile_r, tile_n):
    i = pl.program_id(0)   # row-tile index      ("parallel")
    j = pl.program_id(1)   # column-tile index   ("arbitrary", LN reuse axis)

    # --- LayerNormalization (torch semantics: unbiased std, scalar affine) ------
    # Computed once per row tile (j == 0) into bf16 VMEM scratch, reused for every
    # column tile of W.
    @pl.when(j == 0)
    def _():
        x = x_ref[...].astype(jnp.float32)
        mean = jnp.mean(x, axis=-1, keepdims=True)
        centered = x - mean
        var_unbiased = (jnp.sum(centered * centered, axis=-1, keepdims=True)
                        / float(hidden - 1))
        std = jnp.sqrt(var_unbiased)
        # per-row (tile_r, 1) scale; reciprocal goes to the otherwise-idle EUP slot.
        scale = alpha_ref[0] * pl.reciprocal(std + EPS, approx=True)
        normed_ref[...] = (centered * scale + lnbias_ref[0]).astype(jnp.bfloat16)

    # --- sublayer: dense H->H on the MXU, bf16 operands, f32 accumulation -------
    y = jnp.dot(normed_ref[...], w_ref[...], preferred_element_type=jnp.float32)
    y = y + b_ref[...].astype(jnp.float32)

    # --- dropout (training mode, inverted scaling), deterministic per seed ------
    # Counter hash over (global_row, global_col): decorrelated across tiles, no
    # int32 overflow for large R*H, two finalizer rounds (trimmed VALU cost).
    if p > 0.0:
        rows = lax.broadcasted_iota(jnp.int32, (tile_r, tile_n), 0)
        cols = lax.broadcasted_iota(jnp.int32, (tile_r, tile_n), 1)
        grow = (i * tile_r + rows).astype(jnp.uint32)
        gcol = (j * tile_n + cols).astype(jnp.uint32)
        bits = (grow * jnp.uint32(0x9E3779B1)) ^ (gcol * jnp.uint32(0x85EBCA77))
        bits = bits ^ seed_ref[0].astype(jnp.uint32)
        bits = bits ^ (bits >> jnp.uint32(16))
        bits = bits * jnp.uint32(0x85EBCA6B)
        bits = bits ^ (bits >> jnp.uint32(13))
        bits = bits * jnp.uint32(0xC2B2AE35)
        bits = bits ^ (bits >> jnp.uint32(16))
        thresh = jnp.uint32(min(int(p * 4294967296.0), 0xFFFFFFFF))
        keep = bits >= thresh
        y = jnp.where(keep, y * (1.0 / (1.0 - p)), 0.0)

    # --- residual add (f32): the matching column slice of the x row tile --------
    if tile_n == hidden:
        x_cols = x_ref[...].astype(jnp.float32)
    else:
        start = pl.multiple_of(j * tile_n, tile_n)   # tile_n is 128/256-aligned here
        x_cols = x_ref[:, pl.ds(start, tile_n)].astype(jnp.float32)
    o_ref[...] = (x_cols + y).astype(o_ref.dtype)


# -----------------------------------------------------------------------------
# Wrapper
# -----------------------------------------------------------------------------
def residual_connection(x, w, b, alpha, ln_bias, seed, *, p=0.1,
                        tile_r=None, tile_n=None):
    """ResidualConnection forward: X + dropout(dense(LayerNorm(X))).

    x: (B, S, H) f32; w: (H, H) (pass bf16 to avoid a per-call cast); b: (H,);
    alpha/ln_bias: (1,) f32 (LayerNormalization params); seed: (1,) int32.
    """
    if not (0.0 <= p < 1.0):
        raise ValueError(f"dropout p must be in [0, 1), got {p}")

    B, S, H = x.shape
    R = B * S
    x2 = x.reshape(R, H)
    # Cast only if needed: convert W once at parameter setup and pass bf16.
    w_bf16 = w if w.dtype == jnp.bfloat16 else w.astype(jnp.bfloat16)
    b2 = b.reshape(1, H).astype(jnp.float32)

    # --- generation-aware VMEM budgeting -------------------------------------
    vmem_cap = _vmem_capacity_bytes()
    vmem_limit = min(int(vmem_cap * 0.75), 128 * 1024 * 1024)
    work_budget = int(vmem_cap * 0.60)            # headroom for Mosaic scratch

    if tile_n is None:
        tile_n = _pick_tile_n(H, work_budget // 2)
    if H % tile_n != 0:
        raise ValueError(f"tile_n={tile_n} must divide H={H}")
    n_col = H // tile_n
    w_block_bytes = H * tile_n * 2 * (1 if n_col == 1 else 2)

    if tile_r is None:
        tile_r = _pick_tile_r(R, H, max(1 << 20, work_budget - w_block_bytes))
    if R % tile_r != 0:
        raise ValueError(f"tile_r={tile_r} must divide R={R} (= batch*seq)")

    grid = (R // tile_r, n_col)
    kernel = functools.partial(residual_kernel, p=p, hidden=H,
                               tile_r=tile_r, tile_n=tile_n)

    cost = pl.CostEstimate(
        flops=2 * R * H * H,
        transcendentals=R,                         # per-row reciprocal
        bytes_accessed=2 * R * H * 4 + H * H * 2 + H * 4,
    )
    out_shape = jax.ShapeDtypeStruct((R, H), x.dtype)

    def build_specs(single_buffer_resident):
        # W / b: with a single column tile their index_map is constant, so double
        # buffering buys zero overlap and only doubles VMEM -> single-buffer them.
        wb_kwargs = {}
        if single_buffer_resident and n_col == 1:
            wb_kwargs = {"pipeline_mode": pl.Buffered(1)}
        in_specs = [
            pl.BlockSpec(memory_space=pltpu.SMEM),               # seed    (1,) i32
            pl.BlockSpec(memory_space=pltpu.SMEM),               # alpha   (1,) f32
            pl.BlockSpec(memory_space=pltpu.SMEM),               # ln bias (1,) f32
            pl.BlockSpec((tile_r, H), lambda i, j: (i, 0)),      # x: streamed rows
            pl.BlockSpec((H, tile_n), lambda i, j: (0, j), **wb_kwargs),   # W cols
            pl.BlockSpec((1, tile_n), lambda i, j: (0, j), **wb_kwargs),   # bias
        ]
        out_specs = pl.BlockSpec((tile_r, tile_n), lambda i, j: (i, j))
        return in_specs, out_specs

    def run(single_buffer_resident):
        in_specs, out_specs = build_specs(single_buffer_resident)
        return pl.pallas_call(
            kernel,
            out_shape=out_shape,
            grid=grid,
            in_specs=in_specs,
            out_specs=out_specs,
            scratch_shapes=[pltpu.VMEM((tile_r, H), jnp.bfloat16)],  # LN output
            compiler_params=pltpu.CompilerParams(
                # Row axis shards across TensorCores on multi-TC parts (v7x);
                # the column/LN-reuse axis must stay "arbitrary".
                # TODO(synk): verify 2-TC sharding on v7x in a profile; switch to
                # pltpu.CORE_PARALLEL if the row axis runs serially.
                dimension_semantics=("parallel", "arbitrary"),
                vmem_limit_bytes=vmem_limit,
            ),
            cost_estimate=cost,
        )(seed, alpha, ln_bias, x2, w_bf16, b2)

    try:
        out = run(True)
    except Exception:
        # Fallback if this JAX build rejects pipeline_mode=pl.Buffered(1).
        out = run(False)
    return out.reshape(B, S, H)


if __name__ == "__main__":
    B, S, H = 2, 8, 32
    key = jax.random.PRNGKey(0)
    kx, kw, kb = jax.random.split(key, 3)

    # deterministic example input + sublayer (dense) parameters
    x = jax.random.normal(kx, (B, S, H), dtype=jnp.float32)
    # Convert the sublayer weight to bf16 ONCE at parameter setup (hoisted cast).
    w = (jax.random.normal(kw, (H, H), dtype=jnp.float32) * 0.02).astype(jnp.bfloat16)
    b = jax.random.normal(kb, (H,), dtype=jnp.float32) * 0.02

    # LayerNormalization parameters as in __init__: alpha=ones(1), bias=zeros(1)
    alpha = jnp.ones((1,), dtype=jnp.float32)
    ln_bias = jnp.zeros((1,), dtype=jnp.float32)

    seed = jnp.array([1234], dtype=jnp.int32)

    out = residual_connection(x, w, b, alpha, ln_bias, seed, p=0.1)
    jax.block_until_ready(out)
    assert out.shape == (B, S, H) and out.dtype == jnp.float32
    assert bool(jnp.all(jnp.isfinite(out)))
    print("KERNEL_OK")
</pallas_src>

<mosaic_0001>
module attributes {stable_mosaic.version = 11 : i64} {
  func.func @residual_kernel(%arg0: i32, %arg1: i32, %arg2: memref<1xi32, #tpu.memory_space<smem>>, %arg3: memref<1xf32, #tpu.memory_space<smem>>, %arg4: memref<1xf32, #tpu.memory_space<smem>>, %arg5: memref<16x32xf32, #tpu.memory_space<vmem>>, %arg6: memref<32x32xbf16, #tpu.memory_space<vmem>>, %arg7: memref<1x32xf32, #tpu.memory_space<vmem>>, %arg8: memref<16x32xf32, #tpu.memory_space<vmem>>, %arg9: memref<16x32xbf16, #tpu.memory_space<vmem>>) attributes {dimension_semantics = [#tpu.dimension_semantics<parallel>, #tpu.dimension_semantics<arbitrary>], iteration_bounds = array<i64: 1, 1>, scalar_prefetch = 0 : i64, scratch_operands = 1 : i64, tpu.core_type = #tpu.core_type<tc>, window_params = [{transform_indices = @transform_0, window_bounds = array<i64: 1>}, {transform_indices = @transform_1, window_bounds = array<i64: 1>}, {transform_indices = @transform_2, window_bounds = array<i64: 1>}, {transform_indices = @transform_3, window_bounds = array<i64: 16, 32>}, {pipeline_mode = #tpu.pipeline_mode<synchronous>, transform_indices = @transform_4, window_bounds = array<i64: 32, 32>}, {pipeline_mode = #tpu.pipeline_mode<synchronous>, transform_indices = @transform_5, window_bounds = array<i64: 1, 32>}, {transform_indices = @transform_6, window_bounds = array<i64: 16, 32>}]} {
    %c0_i32 = arith.constant 0 : i32
    %0 = arith.cmpi eq, %arg1, %c0_i32 : i32
    %1 = arith.extui %0 : i1 to i32
    %c0_i32_0 = arith.constant 0 : i32
    %2 = arith.cmpi ne, %1, %c0_i32_0 : i32
    scf.if %2 {
      %c0_15 = arith.constant 0 : index
      %c0_16 = arith.constant 0 : index
      %47 = vector.load %arg5[%c0_15, %c0_16] : memref<16x32xf32, #tpu.memory_space<vmem>>, vector<16x32xf32>
      %cst_17 = arith.constant dense<0.000000e+00> : vector<16xf32>
      %48 = vector.multi_reduction <add>, %47, %cst_17 [1] : vector<16x32xf32> to vector<16xf32>
      %49 = vector.shape_cast %48 : vector<16xf32> to vector<16x1xf32>
      %cst_18 = arith.constant 3.200000e+01 : f32
      %50 = vector.broadcast %cst_18 : f32 to vector<16x1xf32>
      %51 = arith.divf %49, %50 : vector<16x1xf32>
      %52 = vector.broadcast %51 : vector<16x1xf32> to vector<16x32xf32>
      %53 = arith.subf %47, %52 : vector<16x32xf32>
      %54 = arith.mulf %53, %53 : vector<16x32xf32>
      %cst_19 = arith.constant dense<0.000000e+00> : vector<16xf32>
      %55 = vector.multi_reduction <add>, %54, %cst_19 [1] : vector<16x32xf32> to vector<16xf32>
      %56 = vector.shape_cast %55 : vector<16xf32> to vector<16x1xf32>
      %cst_20 = arith.constant 3.100000e+01 : f32
      %57 = vector.broadcast %cst_20 : f32 to vector<16x1xf32>
      %58 = arith.divf %56, %57 : vector<16x1xf32>
      %59 = math.sqrt %58 : vector<16x1xf32>
      %c0_21 = arith.constant 0 : index
      %60 = memref.load %arg3[%c0_21] : memref<1xf32, #tpu.memory_space<smem>>
      %cst_22 = arith.constant 9.99999997E-7 : f32
      %61 = vector.broadcast %cst_22 : f32 to vector<16x1xf32>
      %62 = arith.addf %59, %61 : vector<16x1xf32>
      %63 = tpu.reciprocal %62 {approx = true} : vector<16x1xf32> -> vector<16x1xf32>
      %64 = vector.broadcast %60 : f32 to vector<16x1xf32>
      %65 = arith.mulf %64, %63 : vector<16x1xf32>
      %66 = vector.broadcast %65 : vector<16x1xf32> to vector<16x32xf32>
      %67 = arith.mulf %53, %66 : vector<16x32xf32>
      %c0_23 = arith.constant 0 : index
      %68 = memref.load %arg4[%c0_23] : memref<1xf32, #tpu.memory_space<smem>>
      %69 = vector.broadcast %68 : f32 to vector<16x32xf32>
      %70 = arith.addf %67, %69 : vector<16x32xf32>
      %71 = arith.truncf %70 : vector<16x32xf32> to vector<16x32xbf16>
      %c0_24 = arith.constant 0 : index
      %c0_25 = arith.constant 0 : index
      %72 = vector.load %arg9[%c0_24, %c0_25] : memref<16x32xbf16, #tpu.memory_space<vmem>>, vector<16x32xbf16>
      tpu.vector_store %arg9[%c0_24, %c0_25], %71 {strides = array<i32>} : memref<16x32xbf16, #tpu.memory_space<vmem>>, vector<16x32xbf16>,
    } else {
    }
    %c0 = arith.constant 0 : index
    %c0_1 = arith.constant 0 : index
    %3 = vector.load %arg9[%c0, %c0_1] : memref<16x32xbf16, #tpu.memory_space<vmem>>, vector<16x32xbf16>
    %c0_2 = arith.constant 0 : index
    %c0_3 = arith.constant 0 : index
    %4 = vector.load %arg6[%c0_2, %c0_3] : memref<32x32xbf16, #tpu.memory_space<vmem>>, vector<32x32xbf16>
    %cst = arith.constant dense<0.000000e+00> : vector<16x32xf32>
    %5 = tpu.matmul %3, %4, %cst {dimension_numbers = #tpu.dot_dimension_numbers<[1], [0], [0], [1], [0, 0, 1, 1], [], []>} : vector<16x32xbf16>, vector<32x32xbf16>, vector<16x32xf32> -> vector<16x32xf32>
    %c0_4 = arith.constant 0 : index
    %c0_5 = arith.constant 0 : index
    %6 = vector.load %arg7[%c0_4, %c0_5] : memref<1x32xf32, #tpu.memory_space<vmem>>, vector<1x32xf32>
    %7 = vector.broadcast %6 : vector<1x32xf32> to vector<16x32xf32>
    %8 = arith.addf %5, %7 : vector<16x32xf32>
    %9 = tpu.iota {dimensions = array<i32: 0>} : vector<16x32xi32>
    %10 = tpu.iota {dimensions = array<i32: 1>} : vector<16x32xi32>
    %c16_i32 = arith.constant 16 : i32
    %11 = arith.muli %arg0, %c16_i32 : i32
    %12 = vector.broadcast %11 : i32 to vector<16x32xi32>
    %13 = arith.addi %12, %9 : vector<16x32xi32>
    %c32_i32 = arith.constant 32 : i32
    %14 = arith.muli %arg1, %c32_i32 : i32
    %15 = vector.broadcast %14 : i32 to vector<16x32xi32>
    %16 = arith.addi %15, %10 : vector<16x32xi32>
    %c-1640531535_i32 = arith.constant -1640531535 : i32
    %17 = vector.broadcast %c-1640531535_i32 : i32 to vector<16x32xi32>
    %18 = arith.muli %13, %17 : vector<16x32xi32>
    %c-2048144777_i32 = arith.constant -2048144777 : i32
    %19 = vector.broadcast %c-2048144777_i32 : i32 to vector<16x32xi32>
    %20 = arith.muli %16, %19 : vector<16x32xi32>
    %21 = arith.xori %18, %20 : vector<16x32xi32>
    %c0_6 = arith.constant 0 : index
    %22 = memref.load %arg2[%c0_6] : memref<1xi32, #tpu.memory_space<smem>>
    %23 = vector.broadcast %22 : i32 to vector<16x32xi32>
    %24 = arith.xori %21, %23 : vector<16x32xi32>
    %c16_i32_7 = arith.constant 16 : i32
    %25 = vector.broadcast %c16_i32_7 : i32 to vector<16x32xi32>
    %26 = arith.shrui %24, %25 : vector<16x32xi32>
    %27 = arith.xori %24, %26 : vector<16x32xi32>
    %c-2048144789_i32 = arith.constant -2048144789 : i32
    %28 = vector.broadcast %c-2048144789_i32 : i32 to vector<16x32xi32>
    %29 = arith.muli %27, %28 : vector<16x32xi32>
    %c13_i32 = arith.constant 13 : i32
    %30 = vector.broadcast %c13_i32 : i32 to vector<16x32xi32>
    %31 = arith.shrui %29, %30 : vector<16x32xi32>
    %32 = arith.xori %29, %31 : vector<16x32xi32>
    %c-1028477387_i32 = arith.constant -1028477387 : i32
    %33 = vector.broadcast %c-1028477387_i32 : i32 to vector<16x32xi32>
    %34 = arith.muli %32, %33 : vector<16x32xi32>
    %c16_i32_8 = arith.constant 16 : i32
    %35 = vector.broadcast %c16_i32_8 : i32 to vector<16x32xi32>
    %36 = arith.shrui %34, %35 : vector<16x32xi32>
    %37 = arith.xori %34, %36 : vector<16x32xi32>
    %c429496729_i32 = arith.constant 429496729 : i32
    %38 = vector.broadcast %c429496729_i32 : i32 to vector<16x32xi32>
    %39 = arith.cmpi uge, %37, %38 : vector<16x32xi32>
    %cst_9 = arith.constant 1.11111116 : f32
    %40 = vector.broadcast %cst_9 : f32 to vector<16x32xf32>
    %41 = arith.mulf %8, %40 : vector<16x32xf32>
    %cst_10 = arith.constant 0.000000e+00 : f32
    %42 = vector.broadcast %cst_10 : f32 to vector<16x32xf32>
    %43 = arith.select %39, %41, %42 : vector<16x32xi1>, vector<16x32xf32>
    %c0_11 = arith.constant 0 : index
    %c0_12 = arith.constant 0 : index
    %44 = vector.load %arg5[%c0_11, %c0_12] : memref<16x32xf32, #tpu.memory_space<vmem>>, vector<16x32xf32>
    %45 = arith.addf %44, %43 : vector<16x32xf32>
    %c0_13 = arith.constant 0 : index
    %c0_14 = arith.constant 0 : index
    %46 = vector.load %arg8[%c0_13, %c0_14] : memref<16x32xf32, #tpu.memory_space<vmem>>, vector<16x32xf32>
    tpu.vector_store %arg8[%c0_13, %c0_14], %45 {strides = array<i32>} : memref<16x32xf32, #tpu.memory_space<vmem>>, vector<16x32xf32>,
    return
  }
  func.func @transform_0(%arg0: i32, %arg1: i32) -> i32 {
    %c0_i32 = arith.constant 0 : i32
    %c0_i32_0 = arith.constant 0 : i32
    return %c0_i32 : i32
  }
  func.func @transform_1(%arg0: i32, %arg1: i32) -> i32 {
    %c0_i32 = arith.constant 0 : i32
    %c0_i32_0 = arith.constant 0 : i32
    return %c0_i32 : i32
  }
  func.func @transform_2(%arg0: i32, %arg1: i32) -> i32 {
    %c0_i32 = arith.constant 0 : i32
    %c0_i32_0 = arith.constant 0 : i32
    return %c0_i32 : i32
  }
  func.func @transform_3(%arg0: i32, %arg1: i32) -> (i32, i32) {
    %c0_i32 = arith.constant 0 : i32
    %c0_i32_0 = arith.constant 0 : i32
    return %arg0, %c0_i32 : i32, i32
  }
  func.func @transform_4(%arg0: i32, %arg1: i32) -> (i32, i32) {
    %c0_i32 = arith.constant 0 : i32
    %c0_i32_0 = arith.constant 0 : i32
    return %c0_i32, %arg1 : i32, i32
  }
  func.func @transform_5(%arg0: i32, %arg1: i32) -> (i32, i32) {
    %c0_i32 = arith.constant 0 : i32
    %c0_i32_0 = arith.constant 0 : i32
    return %c0_i32, %arg1 : i32, i32
  }
  func.func @transform_6(%arg0: i32, %arg1: i32) -> (i32, i32) {
    %c0_i32 = arith.constant 0 : i32
    return %arg0, %arg1 : i32, i32
  }
}

module attributes {stable_mosaic.version = 11 : i64} {
  func.func @residual_kernel(%arg0: i32, %arg1: i32, %arg2: memref<1xi32, #tpu.memory_space<smem>>, %arg3: memref<1xf32, #tpu.memory_space<smem>>, %arg4: memref<1xf32, #tpu.memory_space<smem>>, %arg5: memref<16x32xf32, #tpu.memory_space<vmem>>, %arg6: memref<32x32xbf16, #tpu.memory_space<vmem>>, %arg7: memref<1x32xf32, #tpu.memory_space<vmem>>, %arg8: memref<16x32xf32, #tpu.memory_space<vmem>>, %arg9: memref<16x32xbf16, #tpu.memory_space<vmem>>) attributes {dimension_semantics = [#tpu.dimension_semantics<parallel>, #tpu.dimension_semantics<arbitrary>], iteration_bounds = array<i64: 1, 1>, scalar_prefetch = 0 : i64, scratch_operands = 1 : i64, tpu.core_type = #tpu.core_type<tc>, window_params = [{transform_indices = @transform_0, window_bounds = array<i64: 1>}, {transform_indices = @transform_1, window_bounds = array<i64: 1>}, {transform_indices = @transform_2, window_bounds = array<i64: 1>}, {transform_indices = @transform_3, window_bounds = array<i64: 16, 32>}, {transform_indices = @transform_4, window_bounds = array<i64: 32, 32>}, {transform_indices = @transform_5, window_bounds = array<i64: 1, 32>}, {transform_indices = @transform_6, window_bounds = array<i64: 16, 32>}]} {
    %c0_i32 = arith.constant 0 : i32
    %0 = arith.cmpi eq, %arg1, %c0_i32 : i32
    %1 = arith.extui %0 : i1 to i32
    %c0_i32_0 = arith.constant 0 : i32
    %2 = arith.cmpi ne, %1, %c0_i32_0 : i32
    scf.if %2 {
      %c0_15 = arith.constant 0 : index
      %c0_16 = arith.constant 0 : index
      %47 = vector.load %arg5[%c0_15, %c0_16] : memref<16x32xf32, #tpu.memory_space<vmem>>, vector<16x32xf32>
      %cst_17 = arith.constant dense<0.000000e+00> : vector<16xf32>
      %48 = vector.multi_reduction <add>, %47, %cst_17 [1] : vector<16x32xf32> to vector<16xf32>
      %49 = vector.shape_cast %48 : vector<16xf32> to vector<16x1xf32>
      %cst_18 = arith.constant 3.200000e+01 : f32
      %50 = vector.broadcast %cst_18 : f32 to vector<16x1xf32>
      %51 = arith.divf %49, %50 : vector<16x1xf32>
      %52 = vector.broadcast %51 : vector<16x1xf32> to vector<16x32xf32>
      %53 = arith.subf %47, %52 : vector<16x32xf32>
      %54 = arith.mulf %53, %53 : vector<16x32xf32>
      %cst_19 = arith.constant dense<0.000000e+00> : vector<16xf32>
      %55 = vector.multi_reduction <add>, %54, %cst_19 [1] : vector<16x32xf32> to vector<16xf32>
      %56 = vector.shape_cast %55 : vector<16xf32> to vector<16x1xf32>
      %cst_20 = arith.constant 3.100000e+01 : f32
      %57 = vector.broadcast %cst_20 : f32 to vector<16x1xf32>
      %58 = arith.divf %56, %57 : vector<16x1xf32>
      %59 = math.sqrt %58 : vector<16x1xf32>
      %c0_21 = arith.constant 0 : index
      %60 = memref.load %arg3[%c0_21] : memref<1xf32, #tpu.memory_space<smem>>
      %cst_22 = arith.constant 9.99999997E-7 : f32
      %61 = vector.broadcast %cst_22 : f32 to vector<16x1xf32>
      %62 = arith.addf %59, %61 : vector<16x1xf32>
      %63 = tpu.reciprocal %62 {approx = true} : vector<16x1xf32> -> vector<16x1xf32>
      %64 = vector.broadcast %60 : f32 to vector<16x1xf32>
      %65 = arith.mulf %64, %63 : vector<16x1xf32>
      %66 = vector.broadcast %65 : vector<16x1xf32> to vector<16x32xf32>
      %67 = arith.mulf %53, %66 : vector<16x32xf32>
      %c0_23 = arith.constant 0 : index
      %68 = memref.load %arg4[%c0_23] : memref<1xf32, #tpu.memory_space<smem>>
      %69 = vector.broadcast %68 : f32 to vector<16x32xf32>
      %70 = arith.addf %67, %69 : vector<16x32xf32>
      %71 = arith.truncf %70 : vector<16x32xf32> to vector<16x32xbf16>
      %c0_24 = arith.constant 0 : index
      %c0_25 = arith.constant 0 : index
      %72 = vector.load %arg9[%c0_24, %c0_25] : memref<16x32xbf16, #tpu.memory_space<vmem>>, vector<16x32xbf16>
      tpu.vector_store %arg9[%c0_24, %c0_25], %71 {strides = array<i32>} : memref<16x32xbf16, #tpu.memory_space<vmem>>, vector<16x32xbf16>,
    } else {
    }
    %c0 = arith.constant 0 : index
    %c0_1 = arith.constant 0 : index
    %3 = vector.load %arg9[%c0, %c0_1] : memref<16x32xbf16, #tpu.memory_space<vmem>>, vector<16x32xbf16>
    %c0_2 = arith.constant 0 : index
    %c0_3 = arith.constant 0 : index
    %4 = vector.load %arg6[%c0_2, %c0_3] : memref<32x32xbf16, #tpu.memory_space<vmem>>, vector<32x32xbf16>
    %cst = arith.constant dense<0.000000e+00> : vector<16x32xf32>
    %5 = tpu.matmul %3, %4, %cst {dimension_numbers = #tpu.dot_dimension_numbers<[1], [0], [0], [1], [0, 0, 1, 1], [], []>} : vector<16x32xbf16>, vector<32x32xbf16>, vector<16x32xf32> -> vector<16x32xf32>
    %c0_4 = arith.constant 0 : index
    %c0_5 = arith.constant 0 : index
    %6 = vector.load %arg7[%c0_4, %c0_5] : memref<1x32xf32, #tpu.memory_space<vmem>>, vector<1x32xf32>
    %7 = vector.broadcast %6 : vector<1x32xf32> to vector<16x32xf32>
    %8 = arith.addf %5, %7 : vector<16x32xf32>
    %9 = tpu.iota {dimensions = array<i32: 0>} : vector<16x32xi32>
    %10 = tpu.iota {dimensions = array<i32: 1>} : vector<16x32xi32>
    %c16_i32 = arith.constant 16 : i32
    %11 = arith.muli %arg0, %c16_i32 : i32
    %12 = vector.broadcast %11 : i32 to vector<16x32xi32>
    %13 = arith.addi %12, %9 : vector<16x32xi32>
    %c32_i32 = arith.constant 32 : i32
    %14 = arith.muli %arg1, %c32_i32 : i32
    %15 = vector.broadcast %14 : i32 to vector<16x32xi32>
    %16 = arith.addi %15, %10 : vector<16x32xi32>
    %c-1640531535_i32 = arith.constant -1640531535 : i32
    %17 = vector.broadcast %c-1640531535_i32 : i32 to vector<16x32xi32>
    %18 = arith.muli %13, %17 : vector<16x32xi32>
    %c-2048144777_i32 = arith.constant -2048144777 : i32
    %19 = vector.broadcast %c-2048144777_i32 : i32 to vector<16x32xi32>
    %20 = arith.muli %16, %19 : vector<16x32xi32>
    %21 = arith.xori %18, %20 : vector<16x32xi32>
    %c0_6 = arith.constant 0 : index
    %22 = memref.load %arg2[%c0_6] : memref<1xi32, #tpu.memory_space<smem>>
    %23 = vector.broadcast %22 : i32 to vector<16x32xi32>
    %24 = arith.xori %21, %23 : vector<16x32xi32>
    %c16_i32_7 = arith.constant 16 : i32
    %25 = vector.broadcast %c16_i32_7 : i32 to vector<16x32xi32>
    %26 = arith.shrui %24, %25 : vector<16x32xi32>
    %27 = arith.xori %24, %26 : vector<16x32xi32>
    %c-2048144789_i32 = arith.constant -2048144789 : i32
    %28 = vector.broadcast %c-2048144789_i32 : i32 to vector<16x32xi32>
    %29 = arith.muli %27, %28 : vector<16x32xi32>
    %c13_i32 = arith.constant 13 : i32
    %30 = vector.broadcast %c13_i32 : i32 to vector<16x32xi32>
    %31 = arith.shrui %29, %30 : vector<16x32xi32>
    %32 = arith.xori %29, %31 : vector<16x32xi32>
    %c-1028477387_i32 = arith.constant -1028477387 : i32
    %33 = vector.broadcast %c-1028477387_i32 : i32 to vector<16x32xi32>
    %34 = arith.muli %32, %33 : vector<16x32xi32>
    %c16_i32_8 = arith.constant 16 : i32
    %35 = vector.broadcast %c16_i32_8 : i32 to vector<16x32xi32>
    %36 = arith.shrui %34, %35 : vector<16x32xi32>
    %37 = arith.xori %34, %36 : vector<16x32xi32>
    %c429496729_i32 = arith.constant 429496729 : i32
    %38 = vector.broadcast %c429496729_i32 : i32 to vector<16x32xi32>
    %39 = arith.cmpi uge, %37, %38 : vector<16x32xi32>
    %cst_9 = arith.constant 1.11111116 : f32
    %40 = vector.broadcast %cst_9 : f32 to vector<16x32xf32>
    %41 = arith.mulf %8, %40 : vector<16x32xf32>
    %cst_10 = arith.constant 0.000000e+00 : f32
    %42 = vector.broadcast %cst_10 : f32 to vector<16x32xf32>
    %43 = arith.select %39, %41, %42 : vector<16x32xi1>, vector<16x32xf32>
    %c0_11 = arith.constant 0 : index
    %c0_12 = arith.constant 0 : index
    %44 = vector.load %arg5[%c0_11, %c0_12] : memref<16x32xf32, #tpu.memory_space<vmem>>, vector<16x32xf32>
    %45 = arith.addf %44, %43 : vector<16x32xf32>
    %c0_13 = arith.constant 0 : index
    %c0_14 = arith.constant 0 : index
    %46 = vector.load %arg8[%c0_13, %c0_14] : memref<16x32xf32, #tpu.memory_space<vmem>>, vector<16x32xf32>
    tpu.vector_store %arg8[%c0_13, %c0_14], %45 {strides = array<i32>} : memref<16x32xf32, #tpu.memory_space<vmem>>, vector<16x32xf32>,
    return
  }
  func.func @transform_0(%arg0: i32, %arg1: i32) -> i32 {
    %c0_i32 = arith.constant 0 : i32
    %c0_i32_0 = arith.constant 0 : i32
    return %c0_i32 : i32
  }
  func.func @transform_1(%arg0: i32, %arg1: i32) -> i32 {
    %c0_i32 = arith.constant 0 : i32
    %c0_i32_0 = arith.constant 0 : i32
    return %c0_i32 : i32
  }
  func.func @transform_2(%arg0: i32, %arg1: i32) -> i32 {
    %c0_i32 = arith.constant 0 : i32
    %c0_i32_0 = arith.constant 0 : i32
    return %c0_i32 : i32
  }
  func.func @transform_3(%arg0: i32, %arg1: i32) -> (i32, i32) {
    %c0_i32 = arith.constant 0 : i32
    %c0_i32_0 = arith.constant 0 : i32
    return %arg0, %c0_i32 : i32, i32
  }
  func.func @transform_4(%arg0: i32, %arg1: i32) -> (i32, i32) {
    %c0_i32 = arith.constant 0 : i32
    %c0_i32_0 = arith.constant 0 : i32
    return %c0_i32, %arg1 : i32, i32
  }
  func.func @transform_5(%arg0: i32, %arg1: i32) -> (i32, i32) {
    %c0_i32 = arith.constant 0 : i32
    %c0_i32_0 = arith.constant 0 : i32
    return %c0_i32, %arg1 : i32, i32
  }
  func.func @transform_6(%arg0: i32, %arg1: i32) -> (i32, i32) {
    %c0_i32 = arith.constant 0 : i32
    return %arg0, %arg1 : i32, i32
  }
}

</mosaic_0001>

<bundles_post_ra>
// kernel: tpu_custom_call.1
= control target key start
LH: loop header
LB: loop body
LE: loop exit
PB: predicated region body
PF: predicated region fallthrough
CT: control target
= control target key end

     0   :  { %14 = vsyncpa [#allocation7], 0  ;;  %s473_s0 = inlined_call_operand.<no memory space> [shape: s32[1], index: 0, kind: input, shape index: {}]   ;;  %s474_s1 = inlined_call_operand.<no memory space> [shape: f32[1], index: 1, kind: input, shape index: {}]   ;;  %s475_s2 = inlined_call_operand.<no memory space> [shape: f32[1], index: 2, kind: input, shape index: {}]   ;;  %s476_s3 = inlined_call_operand.hbm [shape: f32[16,32], index: 3, kind: input, shape index: {}]   ;;  %s477_s4 = inlined_call_operand.hbm [shape: bf16[32,32], index: 4, kind: input, shape index: {}]   ;;  %s478_s5 = inlined_call_operand.vmem [shape: f32[1,32], index: 5, kind: input, shape index: {}]   ;;  %s479_s6 = inlined_call_operand.hbm [shape: f32[16,32], index: 6, kind: output, shape index: {}]  }
   0x1   :  { %15 = vsyncpa [#allocation10], 0 }
   0x2   :  { %16 = vsyncpa [#allocation8], 0  ;;  %s357_s21 = smov [#allocation6]   ;;  %s285_s25 = scalar_lea.hbm %s476_s3, 256 }
   0x3   :  { %s28_s22 = sshll.u32 %s357_s21, 4  ;;  %p286_p0 = scmp.ne.s32.totalorder %s476_s3, %s285_s25  ;;  %s29_s22 = int_to_ptr.vmem [resolvable:$true] %s28_s22 }
   0x4   :  { %p289_p1 = scmp.lt.u32.totalorder %s285_s25, %s476_s3 }
   0x6   :  { %p291_p2 = pnand %p289_p1, %p286_p0 }
   0x8   :  { %294 = shalt.err (!%p291_p2)
}
   0x9   :  { %s295_s30 = scalar_lea.vmem %s29_s22, 256  ;;  %p300_p4 = scmp.lt.s32.totalorder %s29_s22, %s29_s22 }
   0xa   :  { %p296_p3 = scmp.ne.s32.totalorder %s29_s22, %s295_s30  ;;  %p301_p5 = scmp.lt.s32.totalorder %s295_s30, %s295_s30 }
   0xc   :  { %p302_p6 = por %p301_p5, %p300_p4 }
   0xe   :  { %p303_p7 = pnand %p302_p6, %p296_p3 }
  0x10   :  { %306 = shalt.err (!%p303_p7)
}
  0x11   :  { %s358_s7 = smov 128   ;;  %s359_s8 = smov 8  }
  0x12   :  { %34 = dma.hbm_to_vmem [thread:$0]  %s476_s3, 256, %s29_s22, [#allocation7], %s358_s7, %s358_s7, %s359_s8  }
  0x13   :  { %s360_s11 = smov [#allocation9]   ;;  %s307_s15 = scalar_lea.hbm %s477_s4, 256 }
  0x14   :  { %s40_s12 = sshll.u32 %s360_s11, 4  ;;  %p308_p8 = scmp.ne.s32.totalorder %s477_s4, %s307_s15  ;;  %s41_s12 = int_to_ptr.vmem [resolvable:$true] %s40_s12 }
  0x15   :  { %p311_p9 = scmp.lt.u32.totalorder %s307_s15, %s477_s4 }
  0x17   :  { %p313_p10 = pnand %p311_p9, %p308_p8 }
  0x19   :  { %316 = shalt.err (!%p313_p10)
}
  0x1a   :  { %s317_s20 = scalar_lea.vmem %s41_s12, 256  ;;  %p322_p12 = scmp.lt.s32.totalorder %s41_s12, %s41_s12 }
  0x1b   :  { %p318_p11 = scmp.ne.s32.totalorder %s41_s12, %s317_s20  ;;  %p323_p13 = scmp.lt.s32.totalorder %s317_s20, %s317_s20 }
  0x1d   :  { %p324_p0 = por %p323_p13, %p322_p12 }
  0x1f   :  { %p325_p1 = pnand %p324_p0, %p318_p11 }
  0x21   :  { %328 = shalt.err (!%p325_p1)
}
  0x22   :  { %s361_s3 = smov 64   ;;  %s362_s21 = smov 4  }
  0x23   :  { %46 = dma.hbm_to_vmem [thread:$0]  %s477_s4, 256, %s41_s12, [#allocation10], %s361_s3, %s361_s3, %s362_s21  }
  0x24   :  { %351 = dma.done.wait [#allocation7], 256  }
  0x25   :  { %352 = vsyncadd [#allocation7], 4294967040 }
  0x26   :  { %353 = dma.done.wait [#allocation10], 256  }
  0x27   :  { %354 = vsyncadd [#allocation10], 4294967040  ;;  %vm62_vm0 = vcmask 261120   ;;  %v428_v0 = vld [vmem:[#allocation6] sm:$0xff]  ;;  %v430_v1 = vld [vmem:[#allocation6 + $0x8] sm:$0xff]  ;;  %v363_v15 = vmov 0.0   ;;  %v104_v33 = vstv %s474_s1  ;;  %v110_v39 = vstv %s475_s2 }
  0x28   :  { %v63_v2 = vsel %vm62_vm0, %v428_v0, 0.0  ;;  %v66_v3 = vsel %vm62_vm0, %v430_v1, 0.0  ;;  %v275_v14 = vld [vmem:[#allocation9] sm:$0xff]   ;;  %258 = vmatprep.subr.bf16.mxu0 %v363_v15  ;;  %v276_v16 = vld [vmem:[#allocation9 + $0x8] sm:$0xff]   ;;  %vm364_vm1 = vmmov 0   ;;  %v184_v45 = vlaneseq }
  0x29   :  { %64 = vadd.xlane.f32.xlu0 %v63_v2  ;;  %259 = vmatpush3.bf16.msra.mxu0 %v275_v14  ;;  %v202_v53 = vstv %s473_s0  ;;  %s365_s0 = smov [#allocation11]  }
  0x2a   :  { %262 = vmatprep.mubr.msk.bf16.mxu0 %vm364_vm1, %v363_v15  ;;  %260 = vmatprep.subr.bf16.mxu0 %v363_v15  ;;  %v185_v46 = vshrl.u32 %v184_v45, 7  ;;  %v188_v47 = vand.u32 127, %v184_v45  ;;  %s238_s29 = sshll.u32 %s365_s0, 4  ;;  %s239_s29 = int_to_ptr.vmem [resolvable:$true] %s238_s29 }
  0x2b   :  { %p334_p3 = scmp.lt.s32.totalorder %s239_s29, %s239_s29 }
  0x2c   :  { %v186_v48 = vadd.s32 8, %v185_v46  ;;  %v196_v49 = vmul.u32 2654435761, %v185_v46  ;;  %v198_v50 = vmul.u32 2246822519, %v188_v47 }
  0x2d   :  { %67 = vadd.xlane.f32.xlu0 %v66_v3  ;;  %261 = vmatpush3.bf16.msra.mxu0 %v276_v16 }
  0x2e   :  { %v197_v51 = vmul.u32 2654435761, %v186_v48  ;;  %v199_v52 = vxor.u32 %v198_v50, %v196_v49 }
  0x30   :  { %v200_v54 = vxor.u32 %v198_v50, %v197_v51  ;;  %v203_v55 = vxor.u32 %v202_v53, %v199_v52 }
  0x32   :  { %v204_v56 = vxor.u32 %v202_v53, %v200_v54  ;;  %v205_v57 = vshrl.u32 %v203_v55, 16 }
  0x34   :  { %v206_v58 = vshrl.u32 %v204_v56, 16  ;;  %v207_v59 = vxor.u32 %v205_v57, %v203_v55 }
  0x36   :  { %v208_v60 = vxor.u32 %v206_v58, %v204_v56  ;;  %v209_v61 = vmul.u32 2246822507, %v207_v59 }
  0x38   :  { %v210_v62 = vmul.u32 2246822507, %v208_v60  ;;  %v211_v63 = vshrl.u32 %v209_v61, 13 }
  0x3a   :  { %v212_v2 = vshrl.u32 %v210_v62, 13  ;;  %v213_v3 = vxor.u32 %v211_v63, %v209_v61 }
  0xb6   :  { %v65_v4 = vpop.xlane.xlu0 %64 }
  0xb7   :  { %v70_v5 = vmul.f32 0.03125, %v65_v4  ;;  %v214_v4 = vxor.u32 %v212_v2, %v210_v62 }
  0xb9   :  { %v72_v6 = vsub.f32 %v428_v0, %v70_v5  ;;  %v215_v5 = vmul.u32 3266489909, %v213_v3 }
  0xba   :  { %v68_v7 = vpop.xlane.xlu0 %67 }
  0xbb   :  { %v71_v8 = vmul.f32 0.03125, %v68_v7  ;;  %v74_v9 = vmul.f32 %v72_v6, %v72_v6  ;;  %v217_v7 = vshrl.u32 %v215_v5, 16 }
  0xbd   :  { %v73_v10 = vsub.f32 %v430_v1, %v71_v8  ;;  %v76_v11 = vsel %vm62_vm0, %v74_v9, 0.0  ;;  %v251_v9 = vld [vmem:[%s478_s5] ss:$0 sm:$0xff]  ;;  %s329_s5 = scalar_lea.vmem %s239_s29, 256 }
  0xbe   :  { %77 = vadd.xlane.f32.xlu1 %v76_v11  ;;  %p330_p2 = scmp.ne.s32.totalorder %s239_s29, %s329_s5  ;;  %p335_p4 = scmp.lt.s32.totalorder %s329_s5, %s329_s5 }
  0xbf   :  { %v75_v12 = vmul.f32 %v73_v10, %v73_v10 }
  0xc0   :  { %p336_p5 = por %p335_p4, %p334_p3 }
  0xc1   :  { %v79_v13 = vsel %vm62_vm0, %v75_v12, 0.0 }
  0xc2   :  { %80 = vadd.xlane.f32.xlu1 %v79_v13  ;;  %p337_p6 = pnand %p336_p5, %p330_p2 }
 0x14b   :  { %v78_v17 = vpop.xlane.xlu1 %77 }
 0x14c   :  { %v83_v18 = vmul.f32 0.032258064, %v78_v17 }
 0x14e   :  { %277 = vrsqrt.f32 %v83_v18  ;;  %vm87_vm2 = vcmp.eq.f32.partialorder %v83_v18, inf  ;;  %v90_v23 = vand.u32 2147483648, %v83_v18  ;;  %vm89_vm3 = vcmp.eq.f32.partialorder %v83_v18, 0.0 }
 0x14f   :  { %v81_v19 = vpop.xlane.xlu1 %80 }
 0x150   :  { %v84_v20 = vmul.f32 0.032258064, %v81_v19 }
 0x152   :  { %279 = vrsqrt.f32 %v84_v20  ;;  %vm94_vm4 = vcmp.eq.f32.partialorder %v84_v20, inf  ;;  %v97_v29 = vand.u32 2147483648, %v84_v20  ;;  %vm96_vm5 = vcmp.eq.f32.partialorder %v84_v20, 0.0 }
 0x158   :  { %v278_v21 = vpop.eup %277 }
 0x159   :  { %v86_v22 = vmul.f32 %v278_v21, %v83_v18 }
 0x15b   :  { %v88_v24 = vsel %vm87_vm2, %v83_v18, %v86_v22 }
 0x15c   :  { %v280_v25 = vpop.eup %279  ;;  %v91_v26 = vsel %vm89_vm3, %v90_v23, %v88_v24 }
 0x15d   :  { %v100_v27 = vadd.f32 1e-06, %v91_v26  ;;  %v93_v28 = vmul.f32 %v280_v25, %v84_v20 }
 0x15f   :  { %281 = vrcp.f32 %v100_v27  ;;  %v95_v30 = vsel %vm94_vm4, %v84_v20, %v93_v28 }
 0x160   :  { %v98_v31 = vsel %vm96_vm5, %v97_v29, %v95_v30 }
 0x161   :  { %v101_v32 = vadd.f32 1e-06, %v98_v31 }
 0x163   :  { %283 = vrcp.f32 %v101_v32 }
 0x169   :  { %v282_v34 = vpop.eup %281 }
 0x16a   :  { %v105_v35 = vmul.f32 %v282_v34, %v104_v33 }
 0x16c   :  { %v107_v37 = vmul.f32 %v105_v35, %v72_v6  ;;  %v216_v6 = vmul.u32 3266489909, %v214_v4 }
 0x16d   :  { %v284_v36 = vpop.eup %283 }
 0x16e   :  { %v106_v38 = vmul.f32 %v284_v36, %v104_v33  ;;  %v111_v41 = vadd.f32 %v110_v39, %v107_v37  ;;  %v218_v8 = vshrl.u32 %v216_v6, 16 }
 0x170   :  { %v108_v40 = vmul.f32 %v106_v38, %v73_v10  ;;  %v219_v10 = vxor.u32 %v217_v7, %v215_v5  ;;  %v220_v12 = vxor.u32 %v218_v8, %v216_v6 }
 0x172   :  { %v112_v42 = vadd.f32 %v110_v39, %v108_v40  ;;  %vm221_vm6 = vcmp.ge.u32.totalorder %v219_v10, 429496729  ;;  %vm222_vm7 = vcmp.ge.u32.totalorder %v220_v12, 429496729 }
 0x174   :  { %v113_v43 = vpack.c.bf16 %v112_v42, %v111_v41 }
 0x176   :  { %114 = vst.msk [vmem:[#allocation2] sm:$0xff] %vm62_vm0, %v113_v43 }
 0x17d   :  { %v115_v44 = vld [vmem:[#allocation2] sm:$0xff] }
 0x17e   :  { %263 = vmatmul.mubr.msk.bf16.vlgmr.msra.gmra.mrb[0].mxu0 %vm62_vm0, %v115_v44 }
 0x251   :  { %v177_v11 = vpop.f32.mrb[0].mxu0 }
 0x252   :  { %v178_v13 = vadd.f32 %v251_v9, %v177_v11  ;;  %v264_v14 = vpop.f32.mrb[1].mxu0 }
 0x253   :  { %v180_v15 = vpop.f32.mrb[2].mxu0 }
 0x254   :  { %v223_v16 = vmul.f32 1.1111112, %v178_v13  ;;  %v181_v17 = vadd.f32 %v251_v9, %v180_v15  ;;  %v265_v18 = vpop.f32.mrb[3].mxu0 }
 0x256   :  { %v225_v19 = vsel %vm221_vm6, %v223_v16, 0.0  ;;  %v224_v20 = vmul.f32 1.1111112, %v181_v17 }
 0x257   :  { %v229_v21 = vadd.f32 %v225_v19, %v428_v0 }
 0x258   :  { %v226_v22 = vsel %vm222_vm7, %v224_v20, 0.0 }
 0x259   :  { %231 = vst.msk [vmem:[#allocation11] sm:$0xff] %vm62_vm0, %v229_v21  ;;  %v230_v23 = vadd.f32 %v226_v22, %v430_v1 }
 0x25b   :  { %232 = vst.msk [vmem:[#allocation11 + $0x8] sm:$0xff] %vm62_vm0, %v230_v23 }
 0x25c   :  { %340 = shalt.err (!%p337_p6)
}
 0x25d   :  { %s341_s10 = scalar_lea.hbm %s479_s6, 256 }
 0x25e   :  { %p342_p7 = scmp.ne.s32.totalorder %s479_s6, %s341_s10  ;;  %p345_p8 = scmp.lt.u32.totalorder %s341_s10, %s479_s6 }
 0x260   :  { %p347_p9 = pnand %p345_p8, %p342_p7 }
 0x262   :  { %350 = shalt.err (!%p347_p9)
}
 0x263   :  { %244 = dma.vmem_to_hbm [thread:$0]  %s239_s29, 256, %s479_s6, [#allocation8], %s358_s7, %s358_s7, %s359_s8  }
 0x264   :  { %355 = dma.done.wait [#allocation8], 256  }
 0x265   :  { %356 = vsyncadd [#allocation8], 4294967040 }
 0x266   :  { %248 = vsyncpa [#allocation7], 1 }
 0x267   :  { %249 = vsyncpa [#allocation10], 1 }
 0x268   :  { %250 = vsyncpa [#allocation8], 1 }

// kernel: tpu_custom_call.1
= control target key start
LH: loop header
LB: loop body
LE: loop exit
PB: predicated region body
PF: predicated region fallthrough
CT: control target
= control target key end

     0   :  { %14 = vsyncpa [#allocation7], 0  ;;  %s473_s0 = inlined_call_operand.<no memory space> [shape: s32[1], index: 0, kind: input, shape index: {}]   ;;  %s474_s1 = inlined_call_operand.<no memory space> [shape: f32[1], index: 1, kind: input, shape index: {}]   ;;  %s475_s2 = inlined_call_operand.<no memory space> [shape: f32[1], index: 2, kind: input, shape index: {}]   ;;  %s476_s3 = inlined_call_operand.hbm [shape: f32[16,32], index: 3, kind: input, shape index: {}]   ;;  %s477_s4 = inlined_call_operand.hbm [shape: bf16[32,32], index: 4, kind: input, shape index: {}]   ;;  %s478_s5 = inlined_call_operand.vmem [shape: f32[1,32], index: 5, kind: input, shape index: {}]   ;;  %s479_s6 = inlined_call_operand.hbm [shape: f32[16,32], index: 6, kind: output, shape index: {}]  }
   0x1   :  { %15 = vsyncpa [#allocation10], 0 }
   0x2   :  { %16 = vsyncpa [#allocation8], 0  ;;  %s357_s21 = smov [#allocation6]   ;;  %s285_s25 = scalar_lea.hbm %s476_s3, 256 }
   0x3   :  { %s28_s22 = sshll.u32 %s357_s21, 4  ;;  %p286_p0 = scmp.ne.s32.totalorder %s476_s3, %s285_s25  ;;  %s29_s22 = int_to_ptr.vmem [resolvable:$true] %s28_s22 }
   0x4   :  { %p289_p1 = scmp.lt.u32.totalorder %s285_s25, %s476_s3 }
   0x6   :  { %p291_p2 = pnand %p289_p1, %p286_p0 }
   0x8   :  { %294 = shalt.err (!%p291_p2)
}
   0x9   :  { %s295_s30 = scalar_lea.vmem %s29_s22, 256  ;;  %p300_p4 = scmp.lt.s32.totalorder %s29_s22, %s29_s22 }
   0xa   :  { %p296_p3 = scmp.ne.s32.totalorder %s29_s22, %s295_s30  ;;  %p301_p5 = scmp.lt.s32.totalorder %s295_s30, %s295_s30 }
   0xc   :  { %p302_p6 = por %p301_p5, %p300_p4 }
   0xe   :  { %p303_p7 = pnand %p302_p6, %p296_p3 }
  0x10   :  { %306 = shalt.err (!%p303_p7)
}
  0x11   :  { %s358_s7 = smov 128   ;;  %s359_s8 = smov 8  }
  0x12   :  { %34 = dma.hbm_to_vmem [thread:$0]  %s476_s3, 256, %s29_s22, [#allocation7], %s358_s7, %s358_s7, %s359_s8  }
  0x13   :  { %s360_s11 = smov [#allocation9]   ;;  %s307_s15 = scalar_lea.hbm %s477_s4, 256 }
  0x14   :  { %s40_s12 = sshll.u32 %s360_s11, 4  ;;  %p308_p8 = scmp.ne.s32.totalorder %s477_s4, %s307_s15  ;;  %s41_s12 = int_to_ptr.vmem [resolvable:$true] %s40_s12 }
  0x15   :  { %p311_p9 = scmp.lt.u32.totalorder %s307_s15, %s477_s4 }
  0x17   :  { %p313_p10 = pnand %p311_p9, %p308_p8 }
  0x19   :  { %316 = shalt.err (!%p313_p10)
}
  0x1a   :  { %s317_s20 = scalar_lea.vmem %s41_s12, 256  ;;  %p322_p12 = scmp.lt.s32.totalorder %s41_s12, %s41_s12 }
  0x1b   :  { %p318_p11 = scmp.ne.s32.totalorder %s41_s12, %s317_s20  ;;  %p323_p13 = scmp.lt.s32.totalorder %s317_s20, %s317_s20 }
  0x1d   :  { %p324_p0 = por %p323_p13, %p322_p12 }
  0x1f   :  { %p325_p1 = pnand %p324_p0, %p318_p11 }
  0x21   :  { %328 = shalt.err (!%p325_p1)
}
  0x22   :  { %s361_s3 = smov 64   ;;  %s362_s21 = smov 4  }
  0x23   :  { %46 = dma.hbm_to_vmem [thread:$0]  %s477_s4, 256, %s41_s12, [#allocation10], %s361_s3, %s361_s3, %s362_s21  }
  0x24   :  { %351 = dma.done.wait [#allocation7], 256  }
  0x25   :  { %352 = vsyncadd [#allocation7], 4294967040 }
  0x26   :  { %353 = dma.done.wait [#allocation10], 256  }
  0x27   :  { %354 = vsyncadd [#allocation10], 4294967040  ;;  %vm62_vm0 = vcmask 261120   ;;  %v428_v0 = vld [vmem:[#allocation6] sm:$0xff]  ;;  %v430_v1 = vld [vmem:[#allocation6 + $0x8] sm:$0xff]  ;;  %v363_v15 = vmov 0.0   ;;  %v104_v33 = vstv %s474_s1  ;;  %v110_v39 = vstv %s475_s2 }
  0x28   :  { %v63_v2 = vsel %vm62_vm0, %v428_v0, 0.0  ;;  %v66_v3 = vsel %vm62_vm0, %v430_v1, 0.0  ;;  %v275_v14 = vld [vmem:[#allocation9] sm:$0xff]   ;;  %258 = vmatprep.subr.bf16.mxu0 %v363_v15  ;;  %v276_v16 = vld [vmem:[#allocation9 + $0x8] sm:$0xff]   ;;  %vm364_vm1 = vmmov 0   ;;  %v184_v45 = vlaneseq }
  0x29   :  { %64 = vadd.xlane.f32.xlu0 %v63_v2  ;;  %259 = vmatpush3.bf16.msra.mxu0 %v275_v14  ;;  %v202_v53 = vstv %s473_s0  ;;  %s365_s0 = smov [#allocation11]  }
  0x2a   :  { %262 = vmatprep.mubr.msk.bf16.mxu0 %vm364_vm1, %v363_v15  ;;  %260 = vmatprep.subr.bf16.mxu0 %v363_v15  ;;  %v185_v46 = vshrl.u32 %v184_v45, 7  ;;  %v188_v47 = vand.u32 127, %v184_v45  ;;  %s238_s29 = sshll.u32 %s365_s0, 4  ;;  %s239_s29 = int_to_ptr.vmem [resolvable:$true] %s238_s29 }
  0x2b   :  { %p334_p3 = scmp.lt.s32.totalorder %s239_s29, %s239_s29 }
  0x2c   :  { %v186_v48 = vadd.s32 8, %v185_v46  ;;  %v196_v49 = vmul.u32 2654435761, %v185_v46  ;;  %v198_v50 = vmul.u32 2246822519, %v188_v47 }
  0x2d   :  { %67 = vadd.xlane.f32.xlu0 %v66_v3  ;;  %261 = vmatpush3.bf16.msra.mxu0 %v276_v16 }
  0x2e   :  { %v197_v51 = vmul.u32 2654435761, %v186_v48  ;;  %v199_v52 = vxor.u32 %v198_v50, %v196_v49 }
  0x30   :  { %v200_v54 = vxor.u32 %v198_v50, %v197_v51  ;;  %v203_v55 = vxor.u32 %v202_v53, %v199_v52 }
  0x32   :  { %v204_v56 = vxor.u32 %v202_v53, %v200_v54  ;;  %v205_v57 = vshrl.u32 %v203_v55, 16 }
  0x34   :  { %v206_v58 = vshrl.u32 %v204_v56, 16  ;;  %v207_v59 = vxor.u32 %v205_v57, %v203_v55 }
  0x36   :  { %v208_v60 = vxor.u32 %v206_v58, %v204_v56  ;;  %v209_v61 = vmul.u32 2246822507, %v207_v59 }
  0x38   :  { %v210_v62 = vmul.u32 2246822507, %v208_v60  ;;  %v211_v63 = vshrl.u32 %v209_v61, 13 }
  0x3a   :  { %v212_v2 = vshrl.u32 %v210_v62, 13  ;;  %v213_v3 = vxor.u32 %v211_v63, %v209_v61 }
  0xb6   :  { %v65_v4 = vpop.xlane.xlu0 %64 }
  0xb7   :  { %v70_v5 = vmul.f32 0.03125, %v65_v4  ;;  %v214_v4 = vxor.u32 %v212_v2, %v210_v62 }
  0xb9   :  { %v72_v6 = vsub.f32 %v428_v0, %v70_v5  ;;  %v215_v5 = vmul.u32 3266489909, %v213_v3 }
  0xba   :  { %v68_v7 = vpop.xlane.xlu0 %67 }
  0xbb   :  { %v71_v8 = vmul.f32 0.03125, %v68_v7  ;;  %v74_v9 = vmul.f32 %v72_v6, %v72_v6  ;;  %v217_v7 = vshrl.u32 %v215_v5, 16 }
  0xbd   :  { %v73_v10 = vsub.f32 %v430_v1, %v71_v8  ;;  %v76_v11 = vsel %vm62_vm0, %v74_v9, 0.0  ;;  %v251_v9 = vld [vmem:[%s478_s5] ss:$0 sm:$0xff]  ;;  %s329_s5 = scalar_lea.vmem %s239_s29, 256 }
  0xbe   :  { %77 = vadd.xlane.f32.xlu1 %v76_v11  ;;  %p330_p2 = scmp.ne.s32.totalorder %s239_s29, %s329_s5  ;;  %p335_p4 = scmp.lt.s32.totalorder %s329_s5, %s329_s5 }
  0xbf   :  { %v75_v12 = vmul.f32 %v73_v10, %v73_v10 }
  0xc0   :  { %p336_p5 = por %p335_p4, %p334_p3 }
  0xc1   :  { %v79_v13 = vsel %vm62_vm0, %v75_v12, 0.0 }
  0xc2   :  { %80 = vadd.xlane.f32.xlu1 %v79_v13  ;;  %p337_p6 = pnand %p336_p5, %p330_p2 }
 0x14b   :  { %v78_v17 = vpop.xlane.xlu1 %77 }
 0x14c   :  { %v83_v18 = vmul.f32 0.032258064, %v78_v17 }
 0x14e   :  { %277 = vrsqrt.f32 %v83_v18  ;;  %vm87_vm2 = vcmp.eq.f32.partialorder %v83_v18, inf  ;;  %v90_v23 = vand.u32 2147483648, %v83_v18  ;;  %vm89_vm3 = vcmp.eq.f32.partialorder %v83_v18, 0.0 }
 0x14f   :  { %v81_v19 = vpop.xlane.xlu1 %80 }
 0x150   :  { %v84_v20 = vmul.f32 0.032258064, %v81_v19 }
 0x152   :  { %279 = vrsqrt.f32 %v84_v20  ;;  %vm94_vm4 = vcmp.eq.f32.partialorder %v84_v20, inf  ;;  %v97_v29 = vand.u32 2147483648, %v84_v20  ;;  %vm96_vm5 = vcmp.eq.f32.partialorder %v84_v20, 0.0 }
 0x158   :  { %v278_v21 = vpop.eup %277 }
 0x159   :  { %v86_v22 = vmul.f32 %v278_v21, %v83_v18 }
 0x15b   :  { %v88_v24 = vsel %vm87_vm2, %v83_v18, %v86_v22 }
 0x15c   :  { %v280_v25 = vpop.eup %279  ;;  %v91_v26 = vsel %vm89_vm3, %v90_v23, %v88_v24 }
 0x15d   :  { %v100_v27 = vadd.f32 1e-06, %v91_v26  ;;  %v93_v28 = vmul.f32 %v280_v25, %v84_v20 }
 0x15f   :  { %281 = vrcp.f32 %v100_v27  ;;  %v95_v30 = vsel %vm94_vm4, %v84_v20, %v93_v28 }
 0x160   :  { %v98_v31 = vsel %vm96_vm5, %v97_v29, %v95_v30 }
 0x161   :  { %v101_v32 = vadd.f32 1e-06, %v98_v31 }
 0x163   :  { %283 = vrcp.f32 %v101_v32 }
 0x169   :  { %v282_v34 = vpop.eup %281 }
 0x16a   :  { %v105_v35 = vmul.f32 %v282_v34, %v104_v33 }
 0x16c   :  { %v107_v37 = vmul.f32 %v105_v35, %v72_v6  ;;  %v216_v6 = vmul.u32 3266489909, %v214_v4 }
 0x16d   :  { %v284_v36 = vpop.eup %283 }
 0x16e   :  { %v106_v38 = vmul.f32 %v284_v36, %v104_v33  ;;  %v111_v41 = vadd.f32 %v110_v39, %v107_v37  ;;  %v218_v8 = vshrl.u32 %v216_v6, 16 }
 0x170   :  { %v108_v40 = vmul.f32 %v106_v38, %v73_v10  ;;  %v219_v10 = vxor.u32 %v217_v7, %v215_v5  ;;  %v220_v12 = vxor.u32 %v218_v8, %v216_v6 }
 0x172   :  { %v112_v42 = vadd.f32 %v110_v39, %v108_v40  ;;  %vm221_vm6 = vcmp.ge.u32.totalorder %v219_v10, 429496729  ;;  %vm222_vm7 = vcmp.ge.u32.totalorder %v220_v12, 429496729 }
 0x174   :  { %v113_v43 = vpack.c.bf16 %v112_v42, %v111_v41 }
 0x176   :  { %114 = vst.msk [vmem:[#allocation2] sm:$0xff] %vm62_vm0, %v113_v43 }
 0x17d   :  { %v115_v44 = vld [vmem:[#allocation2] sm:$0xff] }
 0x17e   :  { %263 = vmatmul.mubr.msk.bf16.vlgmr.msra.gmra.mrb[0].mxu0 %vm62_vm0, %v115_v44 }
 0x251   :  { %v177_v11 = vpop.f32.mrb[0].mxu0 }
 0x252   :  { %v178_v13 = vadd.f32 %v251_v9, %v177_v11  ;;  %v264_v14 = vpop.f32.mrb[1].mxu0 }
 0x253   :  { %v180_v15 = vpop.f32.mrb[2].mxu0 }
 0x254   :  { %v223_v16 = vmul.f32 1.1111112, %v178_v13  ;;  %v181_v17 = vadd.f32 %v251_v9, %v180_v15  ;;  %v265_v18 = vpop.f32.mrb[3].mxu0 }
 0x256   :  { %v225_v19 = vsel %vm221_vm6, %v223_v16, 0.0  ;;  %v224_v20 = vmul.f32 1.1111112, %v181_v17 }
 0x257   :  { %v229_v21 = vadd.f32 %v225_v19, %v428_v0 }
 0x258   :  { %v226_v22 = vsel %vm222_vm7, %v224_v20, 0.0 }
 0x259   :  { %231 = vst.msk [vmem:[#allocation11] sm:$0xff] %vm62_vm0, %v229_v21  ;;  %v230_v23 = vadd.f32 %v226_v22, %v430_v1 }
 0x25b   :  { %232 = vst.msk [vmem:[#allocation11 + $0x8] sm:$0xff] %vm62_vm0, %v230_v23 }
 0x25c   :  { %340 = shalt.err (!%p337_p6)
}
 0x25d   :  { %s341_s10 = scalar_lea.hbm %s479_s6, 256 }
 0x25e   :  { %p342_p7 = scmp.ne.s32.totalorder %s479_s6, %s341_s10  ;;  %p345_p8 = scmp.lt.u32.totalorder %s341_s10, %s479_s6 }
 0x260   :  { %p347_p9 = pnand %p345_p8, %p342_p7 }
 0x262   :  { %350 = shalt.err (!%p347_p9)
}
 0x263   :  { %244 = dma.vmem_to_hbm [thread:$0]  %s239_s29, 256, %s479_s6, [#allocation8], %s358_s7, %s358_s7, %s359_s8  }
 0x264   :  { %355 = dma.done.wait [#allocation8], 256  }
 0x265   :  { %356 = vsyncadd [#allocation8], 4294967040 }
 0x266   :  { %248 = vsyncpa [#allocation7], 1 }
 0x267   :  { %249 = vsyncpa [#allocation10], 1 }
 0x268   :  { %250 = vsyncpa [#allocation8], 1 }

</bundles_post_ra>
